<compile_context>
chip_gen: v5e
topology: v5e:2x2
jax: 0.10.0
libtpu: 0.0.40
codegen_flags: <defaults>
</compile_context>

<pallas_src>
import jax
import jax.numpy as jnp
import numpy as np
from jax.experimental import pallas as pl
from jax.experimental.pallas import tpu as pltpu


def _fast_focal_kernel(out_ref, tgt_ref, ind_ref, cat_ref, mask_ref,
                       neg_out_ref, pos_out_ref, npos_out_ref,
                       neg_acc, gat_acc):
    # out_ref / tgt_ref : (1, C, HW_CHUNK) f32  -- NCHW reshape, HW on lanes
    # ind/cat/mask_ref  : (B, M)                -- tiny metadata, full arrays in VMEM
    # *_out_ref         : (1, 1, 1) f32         -- per-batch partial sums
    # neg_acc           : (1, 1) f32 scratch    -- neg-loss accumulator
    # gat_acc           : (C, M) f32 scratch    -- gathered out[b, :, ind[b, m]]
    b = pl.program_id(0)
    k = pl.program_id(1)
    nk = pl.num_programs(1)
    B, M = ind_ref.shape
    _, C, HWC = out_ref.shape

    @pl.when(k == 0)
    def _init():
        neg_acc[...] = jnp.zeros_like(neg_acc)
        gat_acc[...] = jnp.zeros_like(gat_acc)

    o = out_ref[0]                                     # (C, HWC)
    t = tgt_ref[0]                                     # (C, HWC)

    # ---- negative term over this chunk: log(1 - out) * out^2 * (1 - target)^4
    omt = 1.0 - t
    omt2 = omt * omt
    gt = omt2 * omt2                                   # (1 - target)^4
    neg = jnp.log(1.0 - o) * (o * o) * gt              # (C, HWC)
    neg_acc[...] += jnp.sum(neg)

    # ---- gather out[b, :, ind[b, m]] via a one-hot MXU contraction.
    # Each ind hits exactly one HW chunk, so accumulating over chunks is exact.
    ind_row = ind_ref[pl.ds(b, 1), :]                  # (1, M) int32
    hw_iota = jax.lax.broadcasted_iota(jnp.int32, (HWC, M), 0) + k * HWC
    onehot = (hw_iota == ind_row).astype(jnp.float32)  # (HWC, M)
    gat_acc[...] += jnp.dot(o, onehot, preferred_element_type=jnp.float32)  # (C, M)

    @pl.when(k == nk - 1)
    def _finish():
        cat_row = cat_ref[pl.ds(b, 1), :]              # (1, M) int32
        mask_row = mask_ref[pl.ds(b, 1), :]            # (1, M) f32
        c_iota = jax.lax.broadcasted_iota(jnp.int32, (C, M), 0)
        cat_onehot = (c_iota == cat_row).astype(jnp.float32)                 # (C, M)
        pos_pred = jnp.sum(gat_acc[...] * cat_onehot, axis=0, keepdims=True)  # (1, M)
        omp = 1.0 - pos_pred
        pos = jnp.log(pos_pred) * (omp * omp) * mask_row                     # (1, M)

        neg_out_ref[...] = neg_acc[...].reshape(1, 1, 1)
        pos_out_ref[...] = jnp.sum(pos, axis=1, keepdims=True).reshape(1, 1, 1)
        npos_out_ref[...] = jnp.sum(mask_row, axis=1, keepdims=True).reshape(1, 1, 1)


def _pick_hw_chunk(HW, C, M):
    """Largest multiple-of-128 chunk dividing HW whose feature block and
    (chunk, M) one-hot stay within a conservative per-block VMEM budget
    (keeps 2 tensors x 2 pipeline buffers under v7x's default scoped limit)."""
    budget = 4 * 1024 * 1024                           # bytes per feature block
    max_feat = budget // (C * 4)
    max_onehot = budget // (max(M, 128) * 4)
    limit = min(HW, max_feat, max_onehot)
    if HW <= limit:
        return HW
    c = (limit // 128) * 128
    while c >= 128:
        if HW % c == 0:
            return c
        c -= 128
    return HW  # no clean divisor; fall back to the full map


def fast_focal_loss(out, target, ind, mask, cat):
    B, C, H, W = out.shape
    HW = H * W
    M = ind.shape[1]

    # Free reshape of contiguous NCHW: HW lands on the lane axis, C on sublanes.
    out_f = out.reshape(B, C, HW).astype(jnp.float32)
    tgt_f = target.reshape(B, C, HW).astype(jnp.float32)
    ind_i = ind.astype(jnp.int32)
    cat_i = cat.astype(jnp.int32)
    mask_f = mask.astype(jnp.float32)

    hw_chunk = _pick_hw_chunk(HW, C, M)
    n_chunks = HW // hw_chunk

    neg_p, pos_p, npos_p = pl.pallas_call(
        _fast_focal_kernel,
        out_shape=(
            jax.ShapeDtypeStruct((B, 1, 1), jnp.float32),
            jax.ShapeDtypeStruct((B, 1, 1), jnp.float32),
            jax.ShapeDtypeStruct((B, 1, 1), jnp.float32),
        ),
        grid_spec=pltpu.PrefetchScalarGridSpec(
            num_scalar_prefetch=0,
            grid=(B, n_chunks),
            in_specs=[
                pl.BlockSpec((1, C, hw_chunk), lambda b, k: (b, 0, k)),  # out
                pl.BlockSpec((1, C, hw_chunk), lambda b, k: (b, 0, k)),  # target
                pl.BlockSpec((B, M), lambda b, k: (0, 0)),               # ind
                pl.BlockSpec((B, M), lambda b, k: (0, 0)),               # cat
                pl.BlockSpec((B, M), lambda b, k: (0, 0)),               # mask
            ],
            out_specs=(
                pl.BlockSpec((1, 1, 1), lambda b, k: (b, 0, 0)),         # neg partial
                pl.BlockSpec((1, 1, 1), lambda b, k: (b, 0, 0)),         # pos partial
                pl.BlockSpec((1, 1, 1), lambda b, k: (b, 0, 0)),         # num_pos partial
            ),
            scratch_shapes=[
                pltpu.VMEM((1, 1), jnp.float32),   # neg-loss accumulator
                pltpu.VMEM((C, M), jnp.float32),   # gathered (C, M) preds
            ],
        ),
        compiler_params=pltpu.CompilerParams(
            dimension_semantics=("parallel", "arbitrary")),
    )(out_f, tgt_f, ind_i, cat_i, mask_f)

    neg_loss = jnp.sum(neg_p)
    pos_loss = jnp.sum(pos_p)
    num_pos = jnp.sum(npos_p)
    # TODO(synk): the data-dependent `if num_pos == 0` branch and the tiny
    # cross-batch combine are done with jnp.where in plain JAX (no Pallas win).
    return jnp.where(num_pos > 0,
                     -(pos_loss + neg_loss) / jnp.maximum(num_pos, 1.0),
                     -neg_loss)


def fast_focal_loss_reference(out, target, ind, mask, cat):
    # Pure-JAX transcription of the PyTorch forward for verification.
    B, C, H, W = out.shape
    M = ind.shape[1]
    maskf = mask.astype(jnp.float32)
    gt = jnp.power(1.0 - target, 4)
    neg_loss = jnp.sum(jnp.log(1.0 - out) * jnp.square(out) * gt)
    feat = jnp.transpose(out, (0, 2, 3, 1)).reshape(B, H * W, C)
    idx = jnp.broadcast_to(ind[:, :, None].astype(jnp.int32), (B, M, C))
    pos_pred_pix = jnp.take_along_axis(feat, idx, axis=1)                     # (B, M, C)
    pos_pred = jnp.take_along_axis(
        pos_pred_pix, cat[:, :, None].astype(jnp.int32), axis=2)[..., 0]      # (B, M)
    num_pos = jnp.sum(maskf)
    pos_loss = jnp.sum(jnp.log(pos_pred) * jnp.square(1.0 - pos_pred) * maskf)
    return jnp.where(num_pos > 0,
                     -(pos_loss + neg_loss) / jnp.maximum(num_pos, 1.0),
                     -neg_loss)


if __name__ == "__main__":
    key = jax.random.PRNGKey(0)
    B, C, H, W, M = 2, 4, 16, 16, 8
    k1, k2, k3, k4, k5 = jax.random.split(key, 5)
    # out is a post-sigmoid heatmap in (0, 1); keep it away from 0/1 for finite logs.
    out = jnp.clip(jax.nn.sigmoid(jax.random.normal(k1, (B, C, H, W), jnp.float32)),
                   1e-3, 1.0 - 1e-3)
    target = jax.random.uniform(k2, (B, C, H, W), dtype=jnp.float32)
    ind = jax.random.randint(k3, (B, M), 0, H * W, dtype=jnp.int32)
    cat = jax.random.randint(k4, (B, M), 0, C, dtype=jnp.int32)
    mask = jax.random.bernoulli(k5, 0.75, (B, M)).astype(jnp.float32)

    loss = fast_focal_loss(out, target, ind, mask, cat)
    jax.block_until_ready(loss)

    ref = fast_focal_loss_reference(out, target, ind, mask, cat)
    if not np.allclose(np.asarray(loss), np.asarray(ref), rtol=1e-4, atol=1e-5):
        raise AssertionError(f"mismatch: kernel={loss} ref={ref}")
    print("KERNEL_OK")
</pallas_src>

<mosaic_0001>
module attributes {stable_mosaic.version = 11 : i64} {
  func.func @_fast_focal_kernel(%arg0: i32, %arg1: i32, %arg2: memref<1x4x256xf32, #tpu.memory_space<vmem>>, %arg3: memref<1x4x256xf32, #tpu.memory_space<vmem>>, %arg4: memref<2x8xi32, #tpu.memory_space<vmem>>, %arg5: memref<2x8xi32, #tpu.memory_space<vmem>>, %arg6: memref<2x8xf32, #tpu.memory_space<vmem>>, %arg7: memref<1x1x1xf32, #tpu.memory_space<vmem>>, %arg8: memref<1x1x1xf32, #tpu.memory_space<vmem>>, %arg9: memref<1x1x1xf32, #tpu.memory_space<vmem>>, %arg10: memref<1x1xf32, #tpu.memory_space<vmem>>, %arg11: memref<4x8xf32, #tpu.memory_space<vmem>>) attributes {dimension_semantics = [#tpu.dimension_semantics<parallel>, #tpu.dimension_semantics<arbitrary>], iteration_bounds = array<i64: 2, 1>, scalar_prefetch = 0 : i64, scratch_operands = 2 : i64, tpu.core_type = #tpu.core_type<tc>, window_params = [{transform_indices = @transform_0, window_bounds = array<i64: 1, 4, 256>}, {transform_indices = @transform_1, window_bounds = array<i64: 1, 4, 256>}, {pipeline_mode = #tpu.pipeline_mode<synchronous>, transform_indices = @transform_2, window_bounds = array<i64: 2, 8>}, {pipeline_mode = #tpu.pipeline_mode<synchronous>, transform_indices = @transform_3, window_bounds = array<i64: 2, 8>}, {pipeline_mode = #tpu.pipeline_mode<synchronous>, transform_indices = @transform_4, window_bounds = array<i64: 2, 8>}, {transform_indices = @transform_5, window_bounds = array<i64: 1, 1, 1>}, {transform_indices = @transform_6, window_bounds = array<i64: 1, 1, 1>}, {transform_indices = @transform_7, window_bounds = array<i64: 1, 1, 1>}]} {
    %c0_i32 = arith.constant 0 : i32
    %0 = arith.cmpi eq, %arg1, %c0_i32 : i32
    %1 = arith.extui %0 : i1 to i32
    %c0_i32_0 = arith.constant 0 : i32
    %2 = arith.cmpi ne, %1, %c0_i32_0 : i32
    scf.if %2 {
      %cst_20 = arith.constant 0.000000e+00 : f32
      %42 = vector.broadcast %cst_20 : f32 to vector<1x1xf32>
      %c0_21 = arith.constant 0 : index
      %c0_22 = arith.constant 0 : index
      %43 = vector.load %arg10[%c0_21, %c0_22] : memref<1x1xf32, #tpu.memory_space<vmem>>, vector<1x1xf32>
      tpu.vector_store %arg10[%c0_21, %c0_22], %42 {strides = array<i32>} : memref<1x1xf32, #tpu.memory_space<vmem>>, vector<1x1xf32>,
      %cst_23 = arith.constant 0.000000e+00 : f32
      %44 = vector.broadcast %cst_23 : f32 to vector<4x8xf32>
      %c0_24 = arith.constant 0 : index
      %c0_25 = arith.constant 0 : index
      %45 = vector.load %arg11[%c0_24, %c0_25] : memref<4x8xf32, #tpu.memory_space<vmem>>, vector<4x8xf32>
      tpu.vector_store %arg11[%c0_24, %c0_25], %44 {strides = array<i32>} : memref<4x8xf32, #tpu.memory_space<vmem>>, vector<4x8xf32>,
    } else {
    }
    %c0 = arith.constant 0 : index
    %c0_1 = arith.constant 0 : index
    %c0_2 = arith.constant 0 : index
    %3 = vector.load %arg2[%c0, %c0_1, %c0_2] : memref<1x4x256xf32, #tpu.memory_space<vmem>>, vector<1x4x256xf32>
    %4 = vector.shape_cast %3 : vector<1x4x256xf32> to vector<4x256xf32>
    %c0_3 = arith.constant 0 : index
    %c0_4 = arith.constant 0 : index
    %c0_5 = arith.constant 0 : index
    %5 = vector.load %arg3[%c0_3, %c0_4, %c0_5] : memref<1x4x256xf32, #tpu.memory_space<vmem>>, vector<1x4x256xf32>
    %6 = vector.shape_cast %5 : vector<1x4x256xf32> to vector<4x256xf32>
    %cst = arith.constant 1.000000e+00 : f32
    %7 = vector.broadcast %cst : f32 to vector<4x256xf32>
    %8 = arith.subf %7, %6 : vector<4x256xf32>
    %9 = arith.mulf %8, %8 : vector<4x256xf32>
    %10 = arith.mulf %9, %9 : vector<4x256xf32>
    %cst_6 = arith.constant 1.000000e+00 : f32
    %11 = vector.broadcast %cst_6 : f32 to vector<4x256xf32>
    %12 = arith.subf %11, %4 : vector<4x256xf32>
    %13 = math.log %12 : vector<4x256xf32>
    %14 = arith.mulf %4, %4 : vector<4x256xf32>
    %15 = arith.mulf %13, %14 : vector<4x256xf32>
    %16 = arith.mulf %15, %10 : vector<4x256xf32>
    %c0_7 = arith.constant 0 : index
    %c0_8 = arith.constant 0 : index
    %17 = vector.load %arg10[%c0_7, %c0_8] : memref<1x1xf32, #tpu.memory_space<vmem>>, vector<1x1xf32>
    %18 = vector.shape_cast %16 : vector<4x256xf32> to vector<1x4x256xf32>
    %cst_9 = arith.constant dense<0.000000e+00> : vector<1xf32>
    %19 = vector.multi_reduction <add>, %18, %cst_9 [1, 2] : vector<1x4x256xf32> to vector<1xf32>
    %20 = vector.shape_cast %19 : vector<1xf32> to vector<1x1x1xf32>
    %21 = vector.extract %20[0, 0, 0] : f32 from vector<1x1x1xf32>
    %22 = vector.broadcast %21 : f32 to vector<1x1xf32>
    %23 = arith.addf %17, %22 : vector<1x1xf32>
    %c0_10 = arith.constant 0 : index
    %c0_11 = arith.constant 0 : index
    %24 = vector.load %arg10[%c0_10, %c0_11] : memref<1x1xf32, #tpu.memory_space<vmem>>, vector<1x1xf32>
    tpu.vector_store %arg10[%c0_10, %c0_11], %23 {strides = array<i32>} : memref<1x1xf32, #tpu.memory_space<vmem>>, vector<1x1xf32>,
    %25 = arith.index_cast %arg0 : i32 to index
    %c0_12 = arith.constant 0 : index
    %26 = vector.load %arg4[%25, %c0_12] : memref<2x8xi32, #tpu.memory_space<vmem>>, vector<1x8xi32>
    %27 = tpu.iota {dimensions = array<i32: 0>} : vector<256x8xi32>
    %c256_i32 = arith.constant 256 : i32
    %28 = arith.muli %arg1, %c256_i32 : i32
    %29 = vector.broadcast %28 : i32 to vector<256x8xi32>
    %30 = arith.addi %27, %29 : vector<256x8xi32>
    %31 = vector.broadcast %26 : vector<1x8xi32> to vector<256x8xi32>
    %32 = arith.cmpi eq, %30, %31 : vector<256x8xi32>
    %33 = arith.extui %32 : vector<256x8xi1> to vector<256x8xi32>
    %34 = arith.sitofp %33 : vector<256x8xi32> to vector<256x8xf32>
    %c0_13 = arith.constant 0 : index
    %c0_14 = arith.constant 0 : index
    %35 = vector.load %arg11[%c0_13, %c0_14] : memref<4x8xf32, #tpu.memory_space<vmem>>, vector<4x8xf32>
    %cst_15 = arith.constant dense<0.000000e+00> : vector<4x8xf32>
    %36 = tpu.matmul %4, %34, %cst_15 {dimension_numbers = #tpu.dot_dimension_numbers<[1], [0], [0], [1], [0, 0, 1, 1], [], []>} : vector<4x256xf32>, vector<256x8xf32>, vector<4x8xf32> -> vector<4x8xf32>
    %37 = arith.addf %35, %36 : vector<4x8xf32>
    %c0_16 = arith.constant 0 : index
    %c0_17 = arith.constant 0 : index
    %38 = vector.load %arg11[%c0_16, %c0_17] : memref<4x8xf32, #tpu.memory_space<vmem>>, vector<4x8xf32>
    tpu.vector_store %arg11[%c0_16, %c0_17], %37 {strides = array<i32>} : memref<4x8xf32, #tpu.memory_space<vmem>>, vector<4x8xf32>,
    %c0_i32_18 = arith.constant 0 : i32
    %39 = arith.cmpi eq, %arg1, %c0_i32_18 : i32
    %40 = arith.extui %39 : i1 to i32
    %c0_i32_19 = arith.constant 0 : i32
    %41 = arith.cmpi ne, %40, %c0_i32_19 : i32
    scf.if %41 {
      %42 = arith.index_cast %arg0 : i32 to index
      %c0_20 = arith.constant 0 : index
      %43 = vector.load %arg5[%42, %c0_20] : memref<2x8xi32, #tpu.memory_space<vmem>>, vector<1x8xi32>
      %44 = arith.index_cast %arg0 : i32 to index
      %c0_21 = arith.constant 0 : index
      %45 = vector.load %arg6[%44, %c0_21] : memref<2x8xf32, #tpu.memory_space<vmem>>, vector<1x8xf32>
      %46 = tpu.iota {dimensions = array<i32: 0>} : vector<4x8xi32>
      %47 = vector.broadcast %43 : vector<1x8xi32> to vector<4x8xi32>
      %48 = arith.cmpi eq, %46, %47 : vector<4x8xi32>
      %49 = arith.extui %48 : vector<4x8xi1> to vector<4x8xi32>
      %50 = arith.sitofp %49 : vector<4x8xi32> to vector<4x8xf32>
      %c0_22 = arith.constant 0 : index
      %c0_23 = arith.constant 0 : index
      %51 = vector.load %arg11[%c0_22, %c0_23] : memref<4x8xf32, #tpu.memory_space<vmem>>, vector<4x8xf32>
      %52 = arith.mulf %51, %50 : vector<4x8xf32>
      %cst_24 = arith.constant dense<0.000000e+00> : vector<8xf32>
      %53 = vector.multi_reduction <add>, %52, %cst_24 [0] : vector<4x8xf32> to vector<8xf32>
      %54 = vector.shape_cast %53 : vector<8xf32> to vector<1x8xf32>
      %cst_25 = arith.constant 1.000000e+00 : f32
      %55 = vector.broadcast %cst_25 : f32 to vector<1x8xf32>
      %56 = arith.subf %55, %54 : vector<1x8xf32>
      %57 = math.log %54 : vector<1x8xf32>
      %58 = arith.mulf %56, %56 : vector<1x8xf32>
      %59 = arith.mulf %57, %58 : vector<1x8xf32>
      %60 = arith.mulf %59, %45 : vector<1x8xf32>
      %c0_26 = arith.constant 0 : index
      %c0_27 = arith.constant 0 : index
      %61 = vector.load %arg10[%c0_26, %c0_27] : memref<1x1xf32, #tpu.memory_space<vmem>>, vector<1x1xf32>
      %62 = vector.shape_cast %61 : vector<1x1xf32> to vector<1x1x1xf32>
      %c0_28 = arith.constant 0 : index
      %c0_29 = arith.constant 0 : index
      %c0_30 = arith.constant 0 : index
      %63 = vector.load %arg7[%c0_28, %c0_29, %c0_30] : memref<1x1x1xf32, #tpu.memory_space<vmem>>, vector<1x1x1xf32>
      tpu.vector_store %arg7[%c0_28, %c0_29, %c0_30], %62 {strides = array<i32>} : memref<1x1x1xf32, #tpu.memory_space<vmem>>, vector<1x1x1xf32>,
      %cst_31 = arith.constant dense<0.000000e+00> : vector<1xf32>
      %64 = vector.multi_reduction <add>, %60, %cst_31 [1] : vector<1x8xf32> to vector<1xf32>
      %65 = vector.shape_cast %64 : vector<1xf32> to vector<1x1xf32>
      %66 = vector.shape_cast %65 : vector<1x1xf32> to vector<1x1x1xf32>
      %c0_32 = arith.constant 0 : index
      %c0_33 = arith.constant 0 : index
      %c0_34 = arith.constant 0 : index
      %67 = vector.load %arg8[%c0_32, %c0_33, %c0_34] : memref<1x1x1xf32, #tpu.memory_space<vmem>>, vector<1x1x1xf32>
      tpu.vector_store %arg8[%c0_32, %c0_33, %c0_34], %66 {strides = array<i32>} : memref<1x1x1xf32, #tpu.memory_space<vmem>>, vector<1x1x1xf32>,
      %cst_35 = arith.constant dense<0.000000e+00> : vector<1xf32>
      %68 = vector.multi_reduction <add>, %45, %cst_35 [1] : vector<1x8xf32> to vector<1xf32>
      %69 = vector.shape_cast %68 : vector<1xf32> to vector<1x1xf32>
      %70 = vector.shape_cast %69 : vector<1x1xf32> to vector<1x1x1xf32>
      %c0_36 = arith.constant 0 : index
      %c0_37 = arith.constant 0 : index
      %c0_38 = arith.constant 0 : index
      %71 = vector.load %arg9[%c0_36, %c0_37, %c0_38] : memref<1x1x1xf32, #tpu.memory_space<vmem>>, vector<1x1x1xf32>
      tpu.vector_store %arg9[%c0_36, %c0_37, %c0_38], %70 {strides = array<i32>} : memref<1x1x1xf32, #tpu.memory_space<vmem>>, vector<1x1x1xf32>,
    } else {
    }
    return
  }
  func.func @transform_0(%arg0: i32, %arg1: i32) -> (i32, i32, i32) {
    %c0_i32 = arith.constant 0 : i32
    %c0_i32_0 = arith.constant 0 : i32
    return %arg0, %c0_i32, %arg1 : i32, i32, i32
  }
  func.func @transform_1(%arg0: i32, %arg1: i32) -> (i32, i32, i32) {
    %c0_i32 = arith.constant 0 : i32
    %c0_i32_0 = arith.constant 0 : i32
    return %arg0, %c0_i32, %arg1 : i32, i32, i32
  }
  func.func @transform_2(%arg0: i32, %arg1: i32) -> (i32, i32) {
    %c0_i32 = arith.constant 0 : i32
    %c0_i32_0 = arith.constant 0 : i32
    %c0_i32_1 = arith.constant 0 : i32
    return %c0_i32, %c0_i32_0 : i32, i32
  }
  func.func @transform_3(%arg0: i32, %arg1: i32) -> (i32, i32) {
    %c0_i32 = arith.constant 0 : i32
    %c0_i32_0 = arith.constant 0 : i32
    %c0_i32_1 = arith.constant 0 : i32
    return %c0_i32, %c0_i32_0 : i32, i32
  }
  func.func @transform_4(%arg0: i32, %arg1: i32) -> (i32, i32) {
    %c0_i32 = arith.constant 0 : i32
    %c0_i32_0 = arith.constant 0 : i32
    %c0_i32_1 = arith.constant 0 : i32
    return %c0_i32, %c0_i32_0 : i32, i32
  }
  func.func @transform_5(%arg0: i32, %arg1: i32) -> (i32, i32, i32) {
    %c0_i32 = arith.constant 0 : i32
    %c0_i32_0 = arith.constant 0 : i32
    %c0_i32_1 = arith.constant 0 : i32
    return %arg0, %c0_i32, %c0_i32_0 : i32, i32, i32
  }
  func.func @transform_6(%arg0: i32, %arg1: i32) -> (i32, i32, i32) {
    %c0_i32 = arith.constant 0 : i32
    %c0_i32_0 = arith.constant 0 : i32
    %c0_i32_1 = arith.constant 0 : i32
    return %arg0, %c0_i32, %c0_i32_0 : i32, i32, i32
  }
  func.func @transform_7(%arg0: i32, %arg1: i32) -> (i32, i32, i32) {
    %c0_i32 = arith.constant 0 : i32
    %c0_i32_0 = arith.constant 0 : i32
    %c0_i32_1 = arith.constant 0 : i32
    return %arg0, %c0_i32, %c0_i32_0 : i32, i32, i32
  }
}

</mosaic_0001>

<bundles_post_ra>
// kernel: tpu_custom_call.1
= control target key start
LH: loop header
LB: loop body
LE: loop exit
PB: predicated region body
PF: predicated region fallthrough
CT: control target
= control target key end

     0   :  { %s1541_s0 = inlined_call_operand.hbm [shape: f32[2,4,256], index: 0, kind: input, shape index: {}]   ;;  %s1542_s1 = inlined_call_operand.hbm [shape: f32[2,4,256], index: 1, kind: input, shape index: {}]   ;;  %s1543_s2 = inlined_call_operand.hbm [shape: s32[2,8], index: 2, kind: input, shape index: {}]   ;;  %s1544_s3 = inlined_call_operand.vmem [shape: s32[2,8], index: 3, kind: input, shape index: {}]   ;;  %s1545_s4 = inlined_call_operand.hbm [shape: f32[2,8], index: 4, kind: input, shape index: {}]   ;;  %s1546_s5 = inlined_call_operand.vmem [shape: f32[2,1,1], index: 5, kind: output, shape index: {0}]   ;;  %s1547_s6 = inlined_call_operand.vmem [shape: f32[2,1,1], index: 6, kind: output, shape index: {1}]   ;;  %s1548_s7 = inlined_call_operand.vmem [shape: f32[2,1,1], index: 7, kind: output, shape index: {2}]  }
   0x1   :  { %1552 = sst [smem:[#allocation17_spill]] %s1543_s2 }
   0x2   :  { %1553 = sst [smem:[#allocation18_spill]] %s1545_s4 }
   0x3   :  { %13 = vsyncpa [#allocation5], 0 }
   0x4   :  { %15 = vsyncpa [#allocation5 + $0x1], 0 }
   0x5   :  { %16 = vsyncpa [#allocation7], 0 }
   0x6   :  { %18 = vsyncpa [#allocation7 + $0x1], 0 }
   0x7   :  { %19 = vsyncpa [#allocation10], 0  ;;  %s1272_s24 = smov 0   ;;  %s1274_s25 = smov 0  }
   0x8   :  { %s1276_s26 = smov 0   ;;  %s1278_s27 = smov 0  }
   0x9   :  { %s1280_s28 = smov 0   ;;  %s1282_s29 = smov 0  }
   0xa LB: > { %1554 = sst [smem:[#allocation15_spill]] %s1222_s28  ;;  %s1549_s30 = sadd.s32 4294967295, %s1226_s29   ;;  %s1226_s29 = sphi %s1282_s29, %s25_s29   ;;  %s1222_s28 = sphi %s1280_s28, %s1564_s28   ;;  %s1218_s27 = sphi %s1278_s27, %s1563_s27   ;;  %s1214_s26 = sphi %s1276_s26, %s1567_s26   ;;  %s1210_s25 = sphi %s1274_s25, %s1566_s25   ;;  %s1206_s24 = sphi %s1272_s24, %s1565_s24  }
   0xb   : > { %p59_p0 = scmp.ne.s32.totalorder %s1210_s25, %s1206_s24  ;;  %p1304_p1 = scmp.eq.s32.totalorder %s1549_s30, 0 }
   0xc   : > { %p869_p2 = scmp.ge.s32.totalorder %s1226_s29, 1  ;;  %p239_p3 = scmp.lt.s32.totalorder %s1226_s29, 3 }
   0xd   : > { %p1312_p4 = por %p1304_p1, %p59_p0  ;;  %s1557_s2 = sld [smem:[#allocation17_spill]] }
   0xe   : > { %p1319_p5 = pnand %p869_p2, %p239_p3  ;;  %s1228_s14 = smov [#allocation8]  }
   0xf   : > { %s253_s15 = sshll.u32 %s1228_s14, 4  ;;  %s1559_s4 = sld [smem:[#allocation18_spill]]  ;;  %s254_s15 = int_to_ptr.vmem [resolvable:$true] %s253_s15 }
  0x10   : > { %p967_p6 = pneg %p1319_p5  ;;  %s1229_s19 = smov [#allocation9]  }
  0x11   : > { %s268_s20 = sshll.u32 %s1229_s19, 4  ;;  %s37_s21 = sadd.s32 1, %s1222_s28  ;;  %s269_s20 = int_to_ptr.vmem [resolvable:$true] %s268_s20 }
  0x12   : > { %p968_p7 = pnand %p967_p6, %p1304_p1  ;;  %s46_s22 = sadd.s32 1, %s1214_s26 }
  0x13   : > { %s251_s12 = sshll.u32 %s1557_s2, 4  ;;  %p39_p8 = scmp.ge.s32.totalorder %s37_s21, 2  ;;  %s252_s12 = int_to_ptr.hbm [resolvable:$true] %s251_s12 }
  0x14   : > { %970 = dma.hbm_to_vmem [thread:$0]  (!%p968_p7), %s252_s12, 32, %s254_s15, [#allocation7]  }
  0x15   : > { %s266_s18 = sshll.u32 %s1559_s4, 4  ;;  %p53_p9 = scmp.ne.s32.totalorder %s1214_s26, %s1210_s25  ;;  %s267_s18 = int_to_ptr.hbm [resolvable:$true] %s266_s18 }
  0x16   : > { %973 = dma.hbm_to_vmem [thread:$0]  (!%p968_p7), %s267_s18, 32, %s269_s20, [#allocation10]  }
  0x17   : > { %p54_p10 = scmp.eq.s32.totalorder %s1226_s29, 0  ;;  %p983_p11 = scmp.lt.s32.totalorder %s1226_s29, 2 }
  0x18   : > { %s1569_s21 = smov (%p39_p8, %s37_s21), 0  ;;  %s279_s24 = sand.u32 1, %s1214_s26  }
  0x19   : > { %1560 = sst [smem:[#allocation16_spill]] %s1569_s21  ;;  %p1338_p12 = por %p54_p10, %p53_p9 }
  0x1a   : > { %s41_s10 = ssub.s32 %s1222_s28, %s1569_s21  ;;  %s873_s11 = sshll.u32 %s279_s24, 3 }
  0x1b   : > { %p44_p13 = scmp.eq.s32.totalorder %s41_s10, 0  ;;  %s951_s12 = sshll.u32 %s1222_s28, 3 }
  0x1c   : > { %s290_s17 = scalar_lea.hbm %s1541_s0, %s951_s12  ;;  %s283_s18 = scalar_lea.vmem [#allocation4], %s873_s11 }
  0x1d   : > { %s1347_s14 = scalar_select %p44_p13, %s1214_s26, %s46_s22  }
  0x1e   : > { %s294_s19 = sshll.u32 %s283_s18, 4  ;;  %s292_s20 = sshll.u32 %s290_s17, 4  ;;  %s295_s19 = int_to_ptr.vmem [resolvable:$true] %s294_s19  ;;  %s293_s20 = int_to_ptr.hbm [resolvable:$true] %s292_s20 }
  0x1f   : > { %p975_p0 = pnand %p983_p11, %p1338_p12  ;;  %s312_s10 = scalar_lea.hbm %s1542_s1, %s951_s12 }
  0x20   : > { %s301_s4 = sand.u32 1, %s1226_s29   ;;  %s280_s21 = scalar_lea.sflag [#allocation5], %s279_s24 }
  0x21   : > { %977 = dma.hbm_to_vmem [thread:$0]  (!%p975_p0), %s293_s20, 128, %s295_s19, %s280_s21  }
  0x22   : > { %s314_s22 = sshll.u32 %s312_s10, 4  ;;  %s305_s28 = scalar_lea.vmem [#allocation6], %s873_s11  ;;  %s315_s22 = int_to_ptr.hbm [resolvable:$true] %s314_s22 }
  0x23   : > { %s316_s15 = sshll.u32 %s305_s28, 4  ;;  %s302_s16 = scalar_lea.sflag [#allocation7], %s301_s4  ;;  %s317_s15 = int_to_ptr.vmem [resolvable:$true] %s316_s15 }
  0x24   : > { %980 = dma.hbm_to_vmem [thread:$0]  (!%p975_p0), %s315_s22, 128, %s317_s15, %s302_s16  }
  0x25   : > { %325 = sbr.rel (%p1319_p5) target bundleno = 373 (0x175), region = 40  ;;  %s327_s23 = sand.u32 (!%p1319_p5), 1, %s1210_s25  }
  0x26   : > { %s1363_s17 = sshll.u32 (!%p1319_p5), %s327_s23, 3  ;;  %s328_s2 = scalar_lea.sflag (!%p1319_p5), [#allocation5], %s327_s23 }
  0x27   : > { %s331_s30 = scalar_lea.vmem (!%p1319_p5), [#allocation4], %s1363_s17 }
  0x2a   : > { %1189 = dma.done.wait (%p1312_p4), %s328_s2, 128  }
  0x2b   : > { %1191 = vsyncadd (%p1312_p4), %s328_s2, 4294967168  ;;  %s1562_s28 = sadd.s32 4294967295, %s1226_s29   ;;  %s341_s21 = scalar_lea.vmem [#allocation6], %s1363_s17 }
  0x2c   : > { %s337_s4 = sand.u32 1, %s1562_s28  }
  0x2d   : > { %s338_s13 = scalar_lea.sflag [#allocation7], %s337_s4 }
  0x2e   : > { %1193 = dma.done.wait (%p1312_p4), %s338_s13, 128  }
  0x2f   : > { %1195 = vsyncadd (%p1312_p4), %s338_s13, 4294967168 }
  0x30   : > { %1197 = dma.done.wait (%p1304_p1), [#allocation7], 32  }
  0x31   : > { %1199 = vsyncadd (%p1304_p1), [#allocation7], 4294967264 }
  0x32   : > { %1201 = dma.done.wait (%p1304_p1), [#allocation10], 32  }
  0x33   : > { %1203 = vsyncadd (%p1304_p1), [#allocation10], 4294967264  ;;  %v448_v0 = vlaneseq  ;;  %s446_s9 = scalar_lea.vmem [#allocation8], %s1218_s27  ;;  %v1230_v11 = vmov 1.0   ;;  %v1424_v18 = vld [vmem:[%s331_s30] sm:$0xff]  ;;  %v412_v21 = vld [vmem:[%s341_s21] sm:$0xff]  ;;  %s665_s11 = scalar_lea.vmem %s1544_s3, %s1218_s27 }
  0x34   : > { %v1392_v6 = vld [vmem:[%s446_s9] ss:$0 sm:$0xff]  ;;  %v416_v24 = vsub.f32 1.0, %v1424_v18  ;;  %v413_v26 = vsub.f32 1.0, %v412_v21  ;;  %v419_v33 = vmul.f32 %v1424_v18, %v1424_v18  ;;  %v1231_v53 = vmov 0.0   ;;  %s667_s12 = scalar_lea.vmem [#allocation9], %s1218_s27 }
  0x35   : > { %v1385_v1 = vshrl.u32 %v448_v0, 7  ;;  %v668_v54 = vld [vmem:[%s667_s12] sm:$0x1]  ;;  %p394_p1 = scmp.lt.s32.totalorder %s1218_s27, 1 }
  0x36   : > { %1040 = vlog2.f32 %v416_v24  ;;  %v414_v30 = vmul.f32 %v413_v26, %v413_v26  ;;  %v1039_v61 = vld [vmem:[%s665_s11] ss:$0 sm:$0xff] }
  0x37   : > { %v464_v2 = vadd.s32 120, %v1385_v1  ;;  %v480_v3 = vadd.s32 248, %v1385_v1  ;;  %v463_v4 = vadd.s32 112, %v1385_v1  ;;  %v479_v5 = vadd.s32 240, %v1385_v1  ;;  %s1571_s27 = smov (!%p394_p1, %s1218_s27), 1 }
  0x38   : > { %v462_v7 = vadd.s32 104, %v1385_v1  ;;  %v478_v8 = vadd.s32 232, %v1385_v1  ;;  %v461_v9 = vadd.s32 96, %v1385_v1  ;;  %v477_v10 = vadd.s32 224, %v1385_v1  ;;  %s396_s10 = scalar_lea.vmem %s1546_s5, %s1571_s27  ;;  %s402_s16 = scalar_lea.vmem %s1548_s7, %s1571_s27 }
  0x39   : > { %vm531_vm0 = vcmp.eq.s32.totalorder %v464_v2, %v1392_v6  ;;  %vm547_vm1 = vcmp.eq.s32.totalorder %v480_v3, %v1392_v6  ;;  %vm530_vm2 = vcmp.eq.s32.totalorder %v463_v4, %v1392_v6  ;;  %vm546_vm3 = vcmp.eq.s32.totalorder %v479_v5, %v1392_v6  ;;  %s399_s2 = scalar_lea.vmem %s1547_s6, %s1571_s27 }
  0x3a   : > { %916 = vmatpush.msk.msra.mxu0 %vm531_vm0, %v1230_v11  ;;  %932 = vmatpush.msk.msra.mxu1 %vm547_vm1, %v1230_v11  ;;  %vm529_vm4 = vcmp.eq.s32.totalorder %v462_v7, %v1392_v6  ;;  %vm545_vm5 = vcmp.eq.s32.totalorder %v478_v8, %v1392_v6  ;;  %v460_v12 = vadd.s32 88, %v1385_v1  ;;  %v476_v13 = vadd.s32 216, %v1385_v1 }
  0x3b   : > { %vm528_vm6 = vcmp.eq.s32.totalorder %v461_v9, %v1392_v6  ;;  %vm544_vm7 = vcmp.eq.s32.totalorder %v477_v10, %v1392_v6  ;;  %v459_v14 = vadd.s32 80, %v1385_v1  ;;  %v475_v15 = vadd.s32 208, %v1385_v1 }
  0x3c   : > { %917 = vmatpush.msk.msra.mxu0 %vm530_vm2, %v1230_v11  ;;  %933 = vmatpush.msk.msra.mxu1 %vm546_vm3, %v1230_v11  ;;  %vm527_vm8 = vcmp.eq.s32.totalorder %v460_v12, %v1392_v6  ;;  %vm543_vm9 = vcmp.eq.s32.totalorder %v476_v13, %v1392_v6  ;;  %v458_v16 = vadd.s32 72, %v1385_v1  ;;  %v474_v17 = vadd.s32 200, %v1385_v1  ;;  %v1041_v34 = vpop.eup %1040 }
  0x3d   : > { %vm526_vm10 = vcmp.eq.s32.totalorder %v459_v14, %v1392_v6  ;;  %vm542_vm11 = vcmp.eq.s32.totalorder %v475_v15, %v1392_v6  ;;  %v457_v19 = vadd.s32 64, %v1385_v1  ;;  %v473_v20 = vadd.s32 192, %v1385_v1 }
  0x3e   : > { %918 = vmatpush.msk.msra.mxu0 %vm529_vm4, %v1230_v11  ;;  %934 = vmatpush.msk.msra.mxu1 %vm545_vm5, %v1230_v11  ;;  %v456_v22 = vadd.s32 56, %v1385_v1  ;;  %vm525_vm12 = vcmp.eq.s32.totalorder %v458_v16, %v1392_v6  ;;  %vm541_vm13 = vcmp.eq.s32.totalorder %v474_v17, %v1392_v6  ;;  %v472_v23 = vadd.s32 184, %v1385_v1 }
  0x3f   : > { %v455_v25 = vadd.s32 48, %v1385_v1  ;;  %vm524_vm14 = vcmp.eq.s32.totalorder %v457_v19, %v1392_v6  ;;  %vm540_vm15 = vcmp.eq.s32.totalorder %v473_v20, %v1392_v6  ;;  %v471_v27 = vadd.s32 176, %v1385_v1 }
  0x40   : > { %919 = vmatpush.msk.msra.mxu0 %vm528_vm6, %v1230_v11  ;;  %935 = vmatpush.msk.msra.mxu1 %vm544_vm7, %v1230_v11  ;;  %vm523_vm0 = vcmp.eq.s32.totalorder %v456_v22, %v1392_v6  ;;  %vm539_vm1 = vcmp.eq.s32.totalorder %v472_v23, %v1392_v6  ;;  %v454_v28 = vadd.s32 40, %v1385_v1  ;;  %v470_v29 = vadd.s32 168, %v1385_v1 }
  0x41   : > { %vm522_vm2 = vcmp.eq.s32.totalorder %v455_v25, %v1392_v6  ;;  %vm538_vm3 = vcmp.eq.s32.totalorder %v471_v27, %v1392_v6  ;;  %v453_v31 = vadd.s32 32, %v1385_v1  ;;  %v469_v32 = vadd.s32 160, %v1385_v1 }
  0x42   : > { %920 = vmatpush.msk.msra.mxu0 %vm527_vm8, %v1230_v11  ;;  %936 = vmatpush.msk.msra.mxu1 %vm543_vm9, %v1230_v11  ;;  %vm521_vm4 = vcmp.eq.s32.totalorder %v454_v28, %v1392_v6  ;;  %vm537_vm5 = vcmp.eq.s32.totalorder %v470_v29, %v1392_v6  ;;  %v452_v35 = vadd.s32 24, %v1385_v1  ;;  %v468_v36 = vadd.s32 152, %v1385_v1 }
  0x43   : > { %v415_v37 = vmul.f32 %v414_v30, %v414_v30  ;;  %v418_v38 = vmul.f32 0.6931472, %v1041_v34  ;;  %vm520_vm6 = vcmp.eq.s32.totalorder %v453_v31, %v1392_v6  ;;  %vm536_vm7 = vcmp.eq.s32.totalorder %v469_v32, %v1392_v6 }
  0x44   : > { %921 = vmatpush.msk.msra.mxu0 %vm526_vm10, %v1230_v11  ;;  %937 = vmatpush.msk.msra.mxu1 %vm542_vm11, %v1230_v11  ;;  %v451_v39 = vadd.s32 16, %v1385_v1  ;;  %v467_v40 = vadd.s32 144, %v1385_v1  ;;  %vm519_vm8 = vcmp.eq.s32.totalorder %v452_v35, %v1392_v6  ;;  %vm535_vm9 = vcmp.eq.s32.totalorder %v468_v36, %v1392_v6 }
  0x45   : > { %v420_v41 = vmul.f32 %v419_v33, %v418_v38  ;;  %v450_v42 = vadd.s32 8, %v1385_v1  ;;  %v466_v43 = vadd.s32 136, %v1385_v1  ;;  %v465_v45 = vadd.s32 128, %v1385_v1 }
  0x46   : > { %922 = vmatpush.msk.msra.mxu0 %vm525_vm12, %v1230_v11  ;;  %938 = vmatpush.msk.msra.mxu1 %vm541_vm13, %v1230_v11  ;;  %vm518_vm10 = vcmp.eq.s32.totalorder %v451_v39, %v1392_v6  ;;  %vm534_vm11 = vcmp.eq.s32.totalorder %v467_v40, %v1392_v6 }
  0x47   : > { %v421_v44 = vmul.f32 %v420_v41, %v415_v37  ;;  %vm517_vm12 = vcmp.eq.s32.totalorder %v450_v42, %v1392_v6  ;;  %vm533_vm13 = vcmp.eq.s32.totalorder %v466_v43, %v1392_v6 }
  0x48   : > { %923 = vmatpush.msk.msra.mxu0 %vm524_vm14, %v1230_v11  ;;  %939 = vmatpush.msk.msra.mxu1 %vm540_vm15, %v1230_v11  ;;  %vm516_vm14 = vcmp.eq.s32.totalorder %v1385_v1, %v1392_v6  ;;  %vm532_vm15 = vcmp.eq.s32.totalorder %v465_v45, %v1392_v6 }
  0x49   : > { %424 = vst [vmem:[#allocation1] ss:$2 sm:$0xff] %v421_v44 }
  0x4a   : > { %924 = vmatpush.msk.msra.mxu0 %vm523_vm0, %v1230_v11  ;;  %940 = vmatpush.msk.msra.mxu1 %vm539_vm1, %v1230_v11  ;;  %vm429_vm0 = vcmask 1043456   ;;  %vm409_vm1 = vcmask 60416  }
  0x4b   : > { %410 = vst.msk [vmem:[#allocation3] sm:$0xf] %vm409_vm1, %v1231_v53 }
  0x4c   : > { %925 = vmatpush.msk.msra.mxu0 %vm522_vm2, %v1230_v11  ;;  %941 = vmatpush.msk.msra.mxu1 %vm538_vm3, %v1230_v11  ;;  %vm690_vm2 = vcmask 57344   ;;  %vm670_vm3 = vcmp.eq.s32.totalorder %v1385_v1, %v1039_v61 }
  0x4d   : > { %v695_v55 = vsel %vm690_vm2, %v668_v54, 0.0  ;;  %v948_v62 = vsel %vm670_vm3, 1.0, %v1231_v53 }
  0x4e   : > { %926 = vmatpush.msk.msra.mxu0 %vm521_vm4, %v1230_v11  ;;  %942 = vmatpush.msk.msra.mxu1 %vm537_vm5, %v1230_v11  ;;  %vm407_vm4 = vcmask 0  }
  0x4f   : > { %696 = vadd.xlane.f32.xlu1 %v695_v55  ;;  %408 = vst.msk [vmem:[#allocation2] sm:$0x1] %vm407_vm4, %v1231_v53 }
  0x50   : > { %927 = vmatpush.msk.msra.mxu0 %vm520_vm6, %v1230_v11  ;;  %943 = vmatpush.msk.msra.mxu1 %vm536_vm7, %v1230_v11  ;;  %v425_v46 = vld.sshfl [vmem:[#allocation1] sm:$0xff pattern:$0x75316420]  ;;  %v426_v47 = vld.sshfl [vmem:[#allocation1 + $0x8] sm:$0xff pattern:$0x75316420] }
  0x51   : > { %614 = vst [vmem:[#allocation1] ss:$2 sm:$0xff] %v1424_v18  ;;  %v430_v48 = vsel %vm429_vm0, %v425_v46, 0.0  ;;  %v431_v49 = vsel %vm429_vm0, %v426_v47, 0.0 }
  0x52   : > { %928 = vmatpush.msk.msra.mxu0 %vm519_vm8, %v1230_v11  ;;  %944 = vmatpush.msk.msra.mxu1 %vm535_vm9, %v1230_v11  ;;  %v432_v50 = vadd.f32 %v431_v49, %v430_v48  ;;  %v612_v57 = vld [vmem:[#allocation3] sm:$0xf] }
  0x54   : > { %929 = vmatpush.msk.msra.mxu0 %vm518_vm10, %v1230_v11  ;;  %945 = vmatpush.msk.msra.mxu1 %vm534_vm11, %v1230_v11 }
  0x55   : > { %433 = vadd.xlane.f32.xlu0 %v432_v50 }
  0x56   : > { %930 = vmatpush.msk.msra.mxu0 %vm517_vm12, %v1230_v11  ;;  %946 = vmatpush.msk.msra.mxu1 %vm533_vm13, %v1230_v11  ;;  %v422_v22 = vld [vmem:[#allocation2] sm:$0x1] }
  0x58   : > { %931 = vmatpush.msk.msra.mxu0 %vm516_vm14, %v1230_v11  ;;  %947 = vmatpush.msk.msra.mxu1 %vm532_vm15, %v1230_v11  ;;  %v615_v51 = vld.sshfl [vmem:[#allocation1] sm:$0xff pattern:$0x75316420]  ;;  %v616_v52 = vld.sshfl [vmem:[#allocation1 + $0x8] sm:$0xff pattern:$0x75316420] }
  0x59   : > { %635 = vmatmul.f32.vlgmr.msra.gmra.mxu0 %v615_v51  ;;  %655 = vmatmul.f32.vlgmr.msra.gmra.mxu1 %v616_v52 }
  0xc2   : > { %v697_v26 = vpop.xlane.xlu1 %696 }
  0xc3   : > { %698 = vst.msk [vmem:[%s402_s16] sm:$0x1] %vm407_vm4, %v697_v26 }
  0xc8   : > { %v434_v63 = vpop.xlane.xlu0 %433 }
  0xc9   : > { %v435_v0 = vrot.slane %v434_v63, 4 }
  0xcb   : > { %v436_v4 = vadd.f32 %v435_v0, %v434_v63 }
  0xcd   : > { %v437_v6 = vrot.slane %v436_v4, 2 }
  0xcf   : > { %v438_v8 = vadd.f32 %v437_v6, %v436_v4 }
  0xd1   : > { %v439_v10 = vrot.slane %v438_v8, 1 }
  0xd3   : > { %v440_v12 = vadd.f32 %v439_v10, %v438_v8 }
  0xd5   : > { %953 = vpush %v440_v12 }
  0xd6   : > { %v636_v56 = vpop.f32.mrf.mxu0  ;;  %v656_v58 = vpop.f32.mrf.mxu1 }
  0xd7   : > { %v657_v59 = vadd.f32 %v656_v58, %v636_v56 }
  0xd9   : > { %v659_v60 = vadd.f32 %v657_v59, %v612_v57 }
  0xdb   : > { %661 = vst.msk [vmem:[#allocation3] sm:$0xf] %vm409_vm1, %v659_v60 }
  0xe2   : > { %v673_v2 = vld [vmem:[#allocation3] sm:$0xf] }
  0xe3   : > { %v674_v3 = vmul.f32 %v948_v62, %v673_v2 }
  0xe5   : > { %v675_v5 = vsel %vm409_vm1, %v674_v3, 0.0 }
  0xe6   : > { %v676_v7 = vrot.slane %v675_v5, 4 }
  0xe8   : > { %v677_v9 = vadd.f32 %v676_v7, %v675_v5 }
  0xea   : > { %v678_v11 = vrot.slane %v677_v9, 2 }
  0xec   : > { %v679_v13 = vadd.f32 %v678_v11, %v677_v9 }
  0xee   : > { %v680_v1 = vrot.slane %v679_v13, 1 }
  0xf0   : > { %v681_v14 = vadd.f32 %v680_v1, %v679_v13 }
  0xf2   : > { %1042 = vlog2.f32 %v681_v14  ;;  %v682_v15 = vsub.f32 1.0, %v681_v14 }
  0xf4   : > { %v685_v18 = vmul.f32 %v682_v15, %v682_v15 }
  0xf8   : > { %v1043_v16 = vpop.eup %1042 }
  0xf9   : > { %v684_v17 = vmul.f32 0.6931472, %v1043_v16 }
  0xfb   : > { %v686_v19 = vmul.f32 %v685_v18, %v684_v17 }
  0xfd   : > { %v687_v20 = vmul.f32 %v686_v19, %v668_v54 }
  0xff   : > { %v691_v21 = vsel %vm690_vm2, %v687_v20, 0.0 }
 0x100   : > { %692 = vadd.xlane.f32.xlu0 %v691_v21 }
 0x106   : > { %s954_s18 = spop %953 }
 0x107   : > { %v442_v23 = vstv %s954_s18 }
 0x108   : > { %v443_v24 = vadd.f32 %v442_v23, %v422_v22 }
 0x10a   : > { %445 = vst.msk [vmem:[#allocation2] sm:$0x1] %vm407_vm4, %v443_v24 }
 0x111   : > { %v688_v25 = vld [vmem:[#allocation2] sm:$0x1] }
 0x112   : > { %689 = vst.msk [vmem:[%s396_s10] sm:$0x1] %vm407_vm4, %v688_v25 }
 0x173   : > { %v693_v27 = vpop.xlane.xlu0 %692 }
 0x174   : > { %694 = vst.msk [vmem:[%s399_s2] sm:$0x1] %vm407_vm4, %v693_v27 }
 0x175 PF: > { %s25_s29 = sadd.s32 1, %s1226_s29   ;;  %s1563_s27 = sld [smem:[#allocation15_spill]] }
 0x176   : > { %p22_p2 = scmp.ge.s32.totalorder %s25_s29, 4   ;;  %s1564_s28 = sld [smem:[#allocation16_spill]] }
 0x177   : > { %s1565_s24 = smov %s1210_s25  ;;  %s1566_s25 = smov %s1214_s26 }
 0x178   : > { %s1567_s26 = smov %s1347_s14  ;;  %24 = sbr.rel (!%p22_p2) target bundleno = 10 (0xa), region = 136 }
 0x17d   :  { %740 = vsyncpa [#allocation5], 1 }
 0x17e   :  { %742 = vsyncpa [#allocation5 + $0x1], 1 }
 0x17f   :  { %743 = vsyncpa [#allocation7], 1 }
 0x180   :  { %745 = vsyncpa [#allocation7 + $0x1], 1 }
 0x181   :  { %746 = vsyncpa [#allocation10], 1 }

</bundles_post_ra>
